<compile_context>
chip_gen: v7x
topology: tpu7x:2x2x1
jax: 0.10.0
libtpu: 0.0.40
codegen_flags: <defaults>
</compile_context>

<pallas_src>
import functools

import jax
import jax.numpy as jnp
from jax import lax
from jax.experimental import pallas as pl
from jax.experimental.pallas import tpu as pltpu


def logits_kernel(x_ref, w1_ref, b1_ref, w2_ref, b2_ref, yT_ref,
                  *, batch, tb, compute_dtype, precision):
    """One batch tile: yT_block = W2 @ relu(x_tile @ W1^T + b1)^T + b2, with
    batch-padding columns forced to -inf so the later dim=0 softmax ignores them."""
    i = pl.program_id(0)

    # ----- fc1 + ReLU: h = relu(x @ W1^T + b1), contraction over D_in -------------
    x = x_ref[...].astype(compute_dtype)                          # (tb, D_in)
    h = lax.dot_general(x, w1_ref[...], (((1,), (1,)), ((), ())),
                        preferred_element_type=jnp.float32,
                        precision=precision)                      # (tb, H) f32
    h = jnp.maximum(h + b1_ref[...], 0.0)                         # b1: (1, H)

    # ----- fc2, transposed so batch sits on the lane axis ---------------------------
    # yT[o, b] = sum_h W2[o, h] * h[b, h]
    yT = lax.dot_general(w2_ref[...], h.astype(compute_dtype),
                         (((1,), (1,)), ((), ())),
                         preferred_element_type=jnp.float32,
                         precision=precision)                     # (D_out, tb) f32
    yT = yT + b2_ref[...]                                         # b2: (D_out, 1)

    # Mask padding columns BEFORE the store: when B % tb != 0 the last x block reads
    # past the array (undefined rows); -inf keeps them out of the dim=0 softmax.
    col = i * tb + lax.broadcasted_iota(jnp.int32, yT.shape, 1)
    yT_ref[...] = jnp.where(col < batch, yT, -jnp.inf)


def softmax_dim0_kernel(z_ref, o_ref):
    """softmax over dim=0 of the original (B, D_out) logits == lane (axis=-1)
    reduction of the transposed (D_out, B_pad) logits.  Padding columns hold -inf,
    so exp() maps them to 0 and they drop out of the sum."""
    z = z_ref[...]                                                # (D_out, B_pad) f32
    m = jnp.max(z, axis=1, keepdims=True)
    e = jnp.exp(z - m)
    s = jnp.sum(e, axis=1, keepdims=True)
    r = pl.reciprocal(s, approx=True)                             # cheap EUP path
    r = r * (2.0 - s * r)                                         # one Newton step -> ~f32 exact
    o_ref[...] = e * r


def prepare_params(w1, b1, w2, b2, compute_dtype=jnp.float32):
    """One-time parameter prep: cast the matmul operands to `compute_dtype`
    (f32 or bf16) and reshape the biases into 2-D broadcastable layouts."""
    return (jnp.asarray(w1, compute_dtype),                 # W1: (H, D_in)
            jnp.asarray(b1, jnp.float32).reshape(1, -1),    # b1: (1, H)
            jnp.asarray(w2, compute_dtype),                 # W2: (D_out, H)
            jnp.asarray(b2, jnp.float32).reshape(-1, 1))    # b2: (D_out, 1)


def policy_forward(x, params, *, tb=None):
    """x: (B, D_in); params from prepare_params.
    Returns softmax(fc2(relu(fc1(x))), dim=0) with shape (B, D_out)."""
    w1, b1, w2, b2 = params
    B, D_in = x.shape
    H = w1.shape[0]
    D_out = w2.shape[0]
    compute_dtype = w1.dtype
    precision = (lax.Precision.HIGHEST if compute_dtype == jnp.float32
                 else lax.Precision.DEFAULT)

    # Batch tile: BIG.  Per-step pipeline overhead (~0.35 us) dwarfs the work a small
    # tile carries, so use a single tile up to 4096 rows and 2048-row tiles beyond
    # (x tile is only tb*D_in*4 B even double-buffered; weights are ~18 KiB resident).
    if tb is None:
        tb = B if B <= 4096 else 2048
    tb = min(tb, B)
    if tb < B and tb % 128 != 0:
        raise ValueError("batch tile must be a multiple of 128 when it splits B")
    nb = -(-B // tb)                  # ceil(B / tb)
    b_pad = nb * tb

    kernel = functools.partial(logits_kernel, batch=B, tb=tb,
                               compute_dtype=compute_dtype, precision=precision)

    cost = pl.CostEstimate(
        flops=2 * B * (D_in * H + H * D_out),
        transcendentals=B * D_out,
        bytes_accessed=(x.size * x.dtype.itemsize
                        + w1.size * w1.dtype.itemsize
                        + w2.size * w2.dtype.itemsize
                        + b1.size * 4 + b2.size * 4
                        + b_pad * D_out * 4))

    # Kernel 1: batch-parallel logits, written transposed, lane-dense, per tile.
    yT = pl.pallas_call(
        kernel,
        out_shape=jax.ShapeDtypeStruct((D_out, b_pad), jnp.float32),
        grid=(nb,),
        in_specs=[
            pl.BlockSpec((tb, D_in), lambda i: (i, 0)),      # x: streamed per tile
            pl.BlockSpec((H, D_in), lambda i: (0, 0)),       # W1: VMEM-resident
            pl.BlockSpec((1, H), lambda i: (0, 0)),          # b1
            pl.BlockSpec((D_out, H), lambda i: (0, 0)),      # W2
            pl.BlockSpec((D_out, 1), lambda i: (0, 0)),      # b2
        ],
        out_specs=pl.BlockSpec((D_out, tb), lambda i: (0, i)),
        compiler_params=pltpu.CompilerParams(
            dimension_semantics=("parallel",)),   # independent tiles -> both TCs on v7x
        cost_estimate=cost,
    )(x, w1, b1, w2, b2)

    # Kernel 2: the batch-coupled dim=0 softmax, one tiny invocation (D_out is small).
    probs_T = pl.pallas_call(
        softmax_dim0_kernel,
        out_shape=jax.ShapeDtypeStruct((D_out, b_pad), jnp.float32),
    )(yT)

    # Tiny slice + transpose back to the PyTorch (B, D_out) layout.
    return probs_T[:, :B].T


def init_policy_params(key, input_size, output_size, hidden=128):
    """Deterministic init mimicking nn.Linear defaults (uniform +-1/sqrt(fan_in))."""
    k1, k2, k3, k4 = jax.random.split(key, 4)
    s1 = 1.0 / jnp.sqrt(jnp.float32(input_size))
    s2 = 1.0 / jnp.sqrt(jnp.float32(hidden))
    w1 = jax.random.uniform(k1, (hidden, input_size), jnp.float32, -s1, s1)
    b1 = jax.random.uniform(k2, (hidden,), jnp.float32, -s1, s1)
    w2 = jax.random.uniform(k3, (output_size, hidden), jnp.float32, -s2, s2)
    b2 = jax.random.uniform(k4, (output_size,), jnp.float32, -s2, s2)
    return w1, b1, w2, b2


def _reference(x, w1, b1, w2, b2):
    h = jnp.maximum(jnp.dot(x, w1.T, precision=lax.Precision.HIGHEST) + b1, 0.0)
    y = jnp.dot(h, w2.T, precision=lax.Precision.HIGHEST) + b2
    return jax.nn.softmax(y, axis=0)


if __name__ == "__main__":
    key = jax.random.PRNGKey(0)
    kx, kp, kx2 = jax.random.split(key, 3)

    B, D_IN, D_OUT, H = 8, 32, 4, 128
    x = jax.random.normal(kx, (B, D_IN), dtype=jnp.float32)
    w1, b1, w2, b2 = init_policy_params(kp, D_IN, D_OUT, H)

    fwd = jax.jit(policy_forward, static_argnames=("tb",))
    ref = _reference(x, w1, b1, w2, b2)

    # 1) f32 path (single tile).
    params_f32 = prepare_params(w1, b1, w2, b2, jnp.float32)
    out = jax.block_until_ready(fwd(x, params_f32))
    assert out.shape == (B, D_OUT)
    assert jnp.allclose(out, ref, atol=1e-5, rtol=1e-5)

    # 2) bf16 MXU / streamed-x path (f32 accumulation + f32 epilogue).
    params_bf16 = prepare_params(w1, b1, w2, b2, jnp.bfloat16)
    out_bf16 = jax.block_until_ready(fwd(x.astype(jnp.bfloat16), params_bf16))
    assert out_bf16.shape == (B, D_OUT)
    assert jnp.allclose(out_bf16, ref, atol=3e-2, rtol=1e-1)

    # 3) multi-tile path: non-multiple batch exercises the edge-padding / -inf mask,
    #    and the "parallel" grid lets tiles shard across TensorCores on v7x.
    B2 = 200
    x2 = jax.random.normal(kx2, (B2, D_IN), dtype=jnp.float32)
    out2 = jax.block_until_ready(fwd(x2, params_f32, tb=128))
    ref2 = _reference(x2, w1, b1, w2, b2)
    assert out2.shape == (B2, D_OUT)
    assert jnp.allclose(out2, ref2, atol=1e-5, rtol=1e-5)

    print("KERNEL_OK")
</pallas_src>

<mosaic_0001>
module attributes {stable_mosaic.version = 11 : i64} {
  func.func @softmax_dim0_kernel(%arg0: memref<4x8xf32, #tpu.memory_space<vmem>>, %arg1: memref<4x8xf32, #tpu.memory_space<vmem>>) attributes {dimension_semantics = [], scalar_prefetch = 0 : i64, scratch_operands = 0 : i64, tpu.core_type = #tpu.core_type<tc>} {
    %c0 = arith.constant 0 : index
    %c0_0 = arith.constant 0 : index
    %0 = vector.load %arg0[%c0, %c0_0] : memref<4x8xf32, #tpu.memory_space<vmem>>, vector<4x8xf32>
    %cst = arith.constant dense<0xFF800000> : vector<4xf32>
    %1 = vector.multi_reduction <maximumf>, %0, %cst [1] : vector<4x8xf32> to vector<4xf32>
    %2 = vector.shape_cast %1 : vector<4xf32> to vector<4x1xf32>
    %3 = vector.broadcast %2 : vector<4x1xf32> to vector<4x8xf32>
    %4 = arith.subf %0, %3 : vector<4x8xf32>
    %5 = math.exp %4 : vector<4x8xf32>
    %cst_1 = arith.constant dense<0.000000e+00> : vector<4xf32>
    %6 = vector.multi_reduction <add>, %5, %cst_1 [1] : vector<4x8xf32> to vector<4xf32>
    %7 = vector.shape_cast %6 : vector<4xf32> to vector<4x1xf32>
    %8 = tpu.reciprocal %7 {approx = true} : vector<4x1xf32> -> vector<4x1xf32>
    %9 = arith.mulf %7, %8 : vector<4x1xf32>
    %cst_2 = arith.constant 2.000000e+00 : f32
    %10 = vector.broadcast %cst_2 : f32 to vector<4x1xf32>
    %11 = arith.subf %10, %9 : vector<4x1xf32>
    %12 = arith.mulf %8, %11 : vector<4x1xf32>
    %13 = vector.broadcast %12 : vector<4x1xf32> to vector<4x8xf32>
    %14 = arith.mulf %5, %13 : vector<4x8xf32>
    %c0_3 = arith.constant 0 : index
    %c0_4 = arith.constant 0 : index
    %15 = vector.load %arg1[%c0_3, %c0_4] : memref<4x8xf32, #tpu.memory_space<vmem>>, vector<4x8xf32>
    tpu.vector_store %arg1[%c0_3, %c0_4], %14 {strides = array<i32>} : memref<4x8xf32, #tpu.memory_space<vmem>>, vector<4x8xf32>,
    return
  }
}

module attributes {stable_mosaic.version = 11 : i64} {
  func.func @logits_kernel(%arg0: i32, %arg1: memref<8x32xf32, #tpu.memory_space<vmem>>, %arg2: memref<128x32xf32, #tpu.memory_space<vmem>>, %arg3: memref<1x128xf32, #tpu.memory_space<vmem>>, %arg4: memref<4x128xf32, #tpu.memory_space<vmem>>, %arg5: memref<4x1xf32, #tpu.memory_space<vmem>>, %arg6: memref<4x8xf32, #tpu.memory_space<vmem>>) attributes {dimension_semantics = [#tpu.dimension_semantics<parallel>], iteration_bounds = array<i64: 1>, scalar_prefetch = 0 : i64, scratch_operands = 0 : i64, tpu.core_type = #tpu.core_type<tc>, window_params = [{transform_indices = @transform_0, window_bounds = array<i64: 8, 32>}, {pipeline_mode = #tpu.pipeline_mode<synchronous>, transform_indices = @transform_1, window_bounds = array<i64: 128, 32>}, {pipeline_mode = #tpu.pipeline_mode<synchronous>, transform_indices = @transform_2, window_bounds = array<i64: 1, 128>}, {pipeline_mode = #tpu.pipeline_mode<synchronous>, transform_indices = @transform_3, window_bounds = array<i64: 4, 128>}, {pipeline_mode = #tpu.pipeline_mode<synchronous>, transform_indices = @transform_4, window_bounds = array<i64: 4, 1>}, {transform_indices = @transform_5, window_bounds = array<i64: 4, 8>}]} {
    %c0 = arith.constant 0 : index
    %c0_0 = arith.constant 0 : index
    %0 = vector.load %arg1[%c0, %c0_0] : memref<8x32xf32, #tpu.memory_space<vmem>>, vector<8x32xf32>
    %c0_1 = arith.constant 0 : index
    %c0_2 = arith.constant 0 : index
    %1 = vector.load %arg2[%c0_1, %c0_2] : memref<128x32xf32, #tpu.memory_space<vmem>>, vector<128x32xf32>
    %cst = arith.constant dense<0.000000e+00> : vector<8x128xf32>
    %2 = tpu.matmul %0, %1, %cst {dimension_numbers = #tpu.dot_dimension_numbers<[1], [1], [0], [0], [0, 0, 1, 0], [], []>, precision = #tpu.contract_precision<fp32>} : vector<8x32xf32>, vector<128x32xf32>, vector<8x128xf32> -> vector<8x128xf32>
    %c0_3 = arith.constant 0 : index
    %c0_4 = arith.constant 0 : index
    %3 = vector.load %arg3[%c0_3, %c0_4] : memref<1x128xf32, #tpu.memory_space<vmem>>, vector<1x128xf32>
    %4 = vector.broadcast %3 : vector<1x128xf32> to vector<8x128xf32>
    %5 = arith.addf %2, %4 : vector<8x128xf32>
    %cst_5 = arith.constant 0.000000e+00 : f32
    %6 = vector.broadcast %cst_5 : f32 to vector<8x128xf32>
    %7 = arith.maximumf %5, %6 : vector<8x128xf32>
    %c0_6 = arith.constant 0 : index
    %c0_7 = arith.constant 0 : index
    %8 = vector.load %arg4[%c0_6, %c0_7] : memref<4x128xf32, #tpu.memory_space<vmem>>, vector<4x128xf32>
    %cst_8 = arith.constant dense<0.000000e+00> : vector<4x8xf32>
    %9 = tpu.matmul %8, %7, %cst_8 {dimension_numbers = #tpu.dot_dimension_numbers<[1], [1], [0], [0], [0, 0, 1, 0], [], []>, precision = #tpu.contract_precision<fp32>} : vector<4x128xf32>, vector<8x128xf32>, vector<4x8xf32> -> vector<4x8xf32>
    %c0_9 = arith.constant 0 : index
    %c0_10 = arith.constant 0 : index
    %10 = vector.load %arg5[%c0_9, %c0_10] : memref<4x1xf32, #tpu.memory_space<vmem>>, vector<4x1xf32>
    %11 = vector.broadcast %10 : vector<4x1xf32> to vector<4x8xf32>
    %12 = arith.addf %9, %11 : vector<4x8xf32>
    %c8_i32 = arith.constant 8 : i32
    %13 = arith.muli %arg0, %c8_i32 : i32
    %14 = tpu.iota {dimensions = array<i32: 1>} : vector<4x8xi32>
    %15 = vector.broadcast %13 : i32 to vector<4x8xi32>
    %16 = arith.addi %15, %14 : vector<4x8xi32>
    %c8_i32_11 = arith.constant 8 : i32
    %17 = vector.broadcast %c8_i32_11 : i32 to vector<4x8xi32>
    %18 = arith.cmpi slt, %16, %17 : vector<4x8xi32>
    %cst_12 = arith.constant 0xFF800000 : f32
    %19 = vector.broadcast %cst_12 : f32 to vector<4x8xf32>
    %20 = arith.select %18, %12, %19 : vector<4x8xi1>, vector<4x8xf32>
    %c0_13 = arith.constant 0 : index
    %c0_14 = arith.constant 0 : index
    %21 = vector.load %arg6[%c0_13, %c0_14] : memref<4x8xf32, #tpu.memory_space<vmem>>, vector<4x8xf32>
    tpu.vector_store %arg6[%c0_13, %c0_14], %20 {strides = array<i32>} : memref<4x8xf32, #tpu.memory_space<vmem>>, vector<4x8xf32>,
    return
  }
  func.func @transform_0(%arg0: i32) -> (i32, i32) {
    %c0_i32 = arith.constant 0 : i32
    %c0_i32_0 = arith.constant 0 : i32
    return %arg0, %c0_i32 : i32, i32
  }
  func.func @transform_1(%arg0: i32) -> (i32, i32) {
    %c0_i32 = arith.constant 0 : i32
    %c0_i32_0 = arith.constant 0 : i32
    %c0_i32_1 = arith.constant 0 : i32
    return %c0_i32, %c0_i32_0 : i32, i32
  }
  func.func @transform_2(%arg0: i32) -> (i32, i32) {
    %c0_i32 = arith.constant 0 : i32
    %c0_i32_0 = arith.constant 0 : i32
    %c0_i32_1 = arith.constant 0 : i32
    return %c0_i32, %c0_i32_0 : i32, i32
  }
  func.func @transform_3(%arg0: i32) -> (i32, i32) {
    %c0_i32 = arith.constant 0 : i32
    %c0_i32_0 = arith.constant 0 : i32
    %c0_i32_1 = arith.constant 0 : i32
    return %c0_i32, %c0_i32_0 : i32, i32
  }
  func.func @transform_4(%arg0: i32) -> (i32, i32) {
    %c0_i32 = arith.constant 0 : i32
    %c0_i32_0 = arith.constant 0 : i32
    %c0_i32_1 = arith.constant 0 : i32
    return %c0_i32, %c0_i32_0 : i32, i32
  }
  func.func @transform_5(%arg0: i32) -> (i32, i32) {
    %c0_i32 = arith.constant 0 : i32
    %c0_i32_0 = arith.constant 0 : i32
    return %c0_i32, %arg0 : i32, i32
  }
}

</mosaic_0001>

<bundles_post_ra>
// kernel: policy_forward.3
= control target key start
LH: loop header
LB: loop body
LE: loop exit
PB: predicated region body
PF: predicated region fallthrough
CT: control target
= control target key end

     0   :  { %vm10_vm0 = vcmask 60416   ;;  %s98_s0 = inlined_call_operand.vmem [shape: f32[4,8], index: 0, kind: input, shape index: {}]   ;;  %s99_s1 = inlined_call_operand.hbm [shape: f32[4,8], index: 1, kind: output, shape index: {}]  }
   0x1   :  { %v9_v0 = vld [vmem:[%s98_s0] sm:$0xf] }
   0x2   :  { %6 = vsyncpa [#allocation3], 0  ;;  %v11_v1 = vsel %vm10_vm0, %v9_v0, -inf  ;;  %s69_s8 = smov [#allocation2]  }
   0x3   :  { %12 = vmax.xlane.f32.xlu0 %v11_v1  ;;  %s32_s0 = sshll.u32 %s69_s8, 4  ;;  %s33_s0 = int_to_ptr.vmem [resolvable:$true] %s32_s0 }
   0x4   :  { %s45_s9 = scalar_lea.vmem %s33_s0, 64  ;;  %p50_p1 = scmp.lt.s32.totalorder %s33_s0, %s33_s0 }
   0x5   :  { %p46_p0 = scmp.ne.s32.totalorder %s33_s0, %s45_s9  ;;  %p51_p2 = scmp.lt.s32.totalorder %s45_s9, %s45_s9 }
   0x7   :  { %p52_p3 = por %p51_p2, %p50_p1 }
   0x9   :  { %p53_p4 = pnand %p52_p3, %p46_p0 }
  0x90   :  { %v13_v2 = vpop.xlane.xlu0 %12 }
  0x91   :  { %v14_v3 = vsub.f32 %v9_v0, %v13_v2 }
  0x93   :  { %v15_v4 = vmul.f32 1.442695, %v14_v3 }
  0x95   :  { %41 = vpow2.f32 %v15_v4 }
  0x9f   :  { %v42_v5 = vpop.eup %41 }
  0xa0   :  { %v17_v6 = vsel %vm10_vm0, %v42_v5, 0.0 }
  0xa1   :  { %18 = vadd.xlane.f32.xlu0 %v17_v6 }
 0x12e   :  { %v19_v7 = vpop.xlane.xlu0 %18 }
 0x12f   :  { %43 = vrcp.f32 %v19_v7 }
 0x139   :  { %v44_v8 = vpop.eup %43 }
 0x13a   :  { %v21_v9 = vmul.f32 %v44_v8, %v19_v7 }
 0x13c   :  { %v22_v10 = vsub.f32 2.0, %v21_v9 }
 0x13e   :  { %v23_v11 = vmul.f32 %v44_v8, %v22_v10 }
 0x140   :  { %v24_v12 = vmul.f32 %v42_v5, %v23_v11 }
 0x142   :  { %25 = vst.msk [vmem:[#allocation2] sm:$0xf] %vm10_vm0, %v24_v12 }
 0x143   :  { %56 = shalt.err (!%p53_p4)
}
 0x144   :  { %s57_s12 = scalar_lea.hbm %s99_s1, 64 }
 0x145   :  { %p58_p5 = scmp.ne.s32.totalorder %s99_s1, %s57_s12  ;;  %p61_p6 = scmp.lt.u32.totalorder %s57_s12, %s99_s1 }
 0x147   :  { %p63_p7 = pnand %p61_p6, %p58_p5 }
 0x149   :  { %66 = shalt.err (!%p63_p7)
}
 0x14a   :  { %35 = dma.vmem_to_hbm [thread:$0]  %s33_s0, 64, %s99_s1, [#allocation3]  }
 0x14b   :  { %67 = dma.done.wait [#allocation3], 64  }
 0x14c   :  { %68 = vsyncadd [#allocation3], 4294967232 }
 0x14d   :  { %39 = vsyncpa [#allocation3], 1 }

// kernel: policy_forward.2
= control target key start
LH: loop header
LB: loop body
LE: loop exit
PB: predicated region body
PF: predicated region fallthrough
CT: control target
= control target key end

     0   :  { %vm44_vm0 = vcmask 261120   ;;  %v1728_v0 = vmov 0.0|0.0   ;;  %vm1729_vm1 = vmmov 0   ;;  %v1730_v7 = vmov 0.0   ;;  %s2075_s1 = inlined_call_operand.vmem [shape: f32[128,32], index: 1, kind: input, shape index: {}]   ;;  %s2076_s0 = inlined_call_operand.vmem [shape: f32[8,32], index: 0, kind: input, shape index: {}]   ;;  %s2077_s4 = inlined_call_operand.vmem [shape: f32[4,1], index: 4, kind: input, shape index: {}]   ;;  %s2078_s3 = inlined_call_operand.vmem [shape: f32[4,128], index: 3, kind: input, shape index: {}]   ;;  %s2079_s2 = inlined_call_operand.vmem [shape: f32[1,128], index: 2, kind: input, shape index: {}]   ;;  %s2080_s5 = inlined_call_operand.vmem [shape: f32[4,8], index: 5, kind: output, shape index: {}]  }
   0x1   :  { %1559 = vmatprep.subr.bf16.mxu1 %v1728_v0  ;;  %1631 = vmatprep.subr.bf16.mxu0 %v1728_v0  ;;  %v21_v1 = vld [vmem:[%s2075_s1] sm:$0xff]  ;;  %v22_v2 = vld [vmem:[%s2075_s1 + $0x8] sm:$0xff]  ;;  %v23_v3 = vld [vmem:[%s2075_s1 + $0x10] sm:$0xff]  ;;  %vm1198_vm3 = vcmask 60416  }
   0x2   :  { %v49_v4 = vsel %vm44_vm0, %v21_v1, 0  ;;  %v52_v5 = vsel %vm44_vm0, %v22_v2, 0  ;;  %v24_v6 = vld [vmem:[%s2075_s1 + $0x18] sm:$0xff]  ;;  %1351 = vmatprep.mubr.msk.f32.mxu1 %vm1729_vm1, %v1730_v7  ;;  %1456 = vmatprep.mubr.msk.f32.mxu0 %vm1729_vm1, %v1730_v7  ;;  %v55_v10 = vsel %vm44_vm0, %v23_v3, 0  ;;  %v25_v15 = vld [vmem:[%s2075_s1 + $0x20] sm:$0xff]  ;;  %v26_v16 = vld [vmem:[%s2075_s1 + $0x28] sm:$0xff] }
   0x3   :  { %v97_v8 = vand.u32 4294901760, %v49_v4  ;;  %v100_v9 = vand.u32 4294901760, %v52_v5  ;;  %v58_v11 = vsel %vm44_vm0, %v24_v6, 0  ;;  %v103_v13 = vand.u32 4294901760, %v55_v10  ;;  %v27_v22 = vld [vmem:[%s2075_s1 + $0x30] sm:$0xff]  ;;  %v28_v23 = vld [vmem:[%s2075_s1 + $0x38] sm:$0xff] }
   0x4   :  { %v106_v14 = vand.u32 4294901760, %v58_v11  ;;  %v61_v18 = vsel %vm44_vm0, %v25_v15, 0  ;;  %v64_v19 = vsel %vm44_vm0, %v26_v16, 0  ;;  %v67_v25 = vsel %vm44_vm0, %v27_v22, 0  ;;  %v29_v29 = vld [vmem:[%s2075_s1 + $0x40] sm:$0xff]  ;;  %v30_v30 = vld [vmem:[%s2075_s1 + $0x48] sm:$0xff] }
   0x5   :  { %v1784_v12 = vpack.c.bf16 %v100_v9, %v97_v8  ;;  %v109_v20 = vand.u32 4294901760, %v61_v18  ;;  %v112_v21 = vand.u32 4294901760, %v64_v19  ;;  %v70_v26 = vsel %vm44_vm0, %v28_v23, 0  ;;  %v31_v40 = vld [vmem:[%s2075_s1 + $0x50] sm:$0xff]  ;;  %v32_v41 = vld [vmem:[%s2075_s1 + $0x58] sm:$0xff]  ;;  %v33_v60 = vld [vmem:[%s2075_s1 + $0x60] sm:$0xff] }
   0x6   :  { %v1796_v17 = vpack.c.bf16 %v106_v14, %v103_v13  ;;  %v115_v27 = vand.u32 4294901760, %v67_v25  ;;  %v118_v28 = vand.u32 4294901760, %v70_v26  ;;  %v73_v32 = vsel %vm44_vm0, %v29_v29, 0  ;;  %v34_v61 = vld [vmem:[%s2075_s1 + $0x68] sm:$0xff] }
   0x7   :  { %1561 = vmatpush3.bf16.xpose.msra.mxu1 %v1784_v12  ;;  %1633 = vmatpush3.bf16.xpose.msra.mxu0 %v1784_v12  ;;  %v1810_v24 = vpack.c.bf16 %v112_v21, %v109_v20  ;;  %v76_v33 = vsel %vm44_vm0, %v30_v30, 0  ;;  %v1828_v34 = vsub.f32 %v49_v4, %v97_v8  ;;  %v1830_v35 = vsub.f32 %v52_v5, %v100_v9  ;;  %v20_v5 = vld [vmem:[%s2076_s0] sm:$0xff]  ;;  %v35_v9 = vld [vmem:[%s2075_s1 + $0x70] sm:$0xff] }
   0x8   :  { %1562 = vmatprep.subr.bf16.mxu1 %v1728_v0  ;;  %1634 = vmatprep.subr.bf16.mxu0 %v1728_v0  ;;  %v1824_v31 = vpack.c.bf16 %v118_v28, %v115_v27  ;;  %v1832_v36 = vsub.f32 %v55_v10, %v103_v13  ;;  %v1834_v37 = vsub.f32 %v58_v11, %v106_v14  ;;  %v121_v38 = vand.u32 4294901760, %v73_v32  ;;  %v36_v10 = vld [vmem:[%s2075_s1 + $0x78] sm:$0xff] }
   0x9   :  { %v124_v39 = vand.u32 4294901760, %v76_v33  ;;  %v1608_v42 = vpack.c.bf16 %v1830_v35, %v1828_v34  ;;  %v1844_v43 = vsub.f32 %v61_v18, %v109_v20  ;;  %v1846_v44 = vsub.f32 %v64_v19, %v112_v21 }
   0xa   :  { %v1849_v45 = vsub.f32 %v67_v25, %v115_v27  ;;  %v1852_v46 = vsub.f32 %v70_v26, %v118_v28  ;;  %v1856_v47 = vsub.f32 %v73_v32, %v121_v38  ;;  %v79_v49 = vsel %vm44_vm0, %v31_v40, 0 }
   0xb   :  { %v1858_v48 = vsub.f32 %v76_v33, %v124_v39  ;;  %v82_v50 = vsel %vm44_vm0, %v32_v41, 0  ;;  %v1611_v51 = vpack.c.bf16 %v1834_v37, %v1832_v36  ;;  %v1614_v52 = vpack.c.bf16 %v1846_v44, %v1844_v43 }
   0xc   :  { %v1617_v53 = vpack.c.bf16 %v1852_v46, %v1849_v45  ;;  %v1870_v55 = vpack.c.bf16 %v124_v39, %v121_v38  ;;  %v127_v56 = vand.u32 4294901760, %v79_v49  ;;  %v130_v57 = vand.u32 4294901760, %v82_v50 }
   0xd   :  { %v1620_v54 = vpack.c.bf16 %v1858_v48, %v1856_v47  ;;  %v85_v63 = vsel %vm44_vm0, %v33_v60, 0  ;;  %v88_v1 = vsel %vm44_vm0, %v34_v61, 0  ;;  %v46_v11 = vsel %vm44_vm0, %v20_v5, 0 }
   0xe   :  { %v1872_v58 = vsub.f32 %v79_v49, %v127_v56  ;;  %v1874_v59 = vsub.f32 %v82_v50, %v130_v57  ;;  %v1890_v2 = vpack.c.bf16 %v130_v57, %v127_v56  ;;  %v133_v3 = vand.u32 4294901760, %v85_v63 }
   0xf   :  { %1564 = vmatpush3.bf16.xpose.msra.mxu1 %v1796_v17  ;;  %1636 = vmatpush3.bf16.xpose.msra.mxu0 %v1796_v17  ;;  %v136_v4 = vand.u32 4294901760, %v88_v1  ;;  %v91_v14 = vsel %vm44_vm0, %v35_v9, 0  ;;  %v94_v15 = vsel %vm44_vm0, %v36_v10, 0  ;;  %v1914_v16 = vand.u32 4294901760, %v46_v11 }
  0x10   :  { %1565 = vmatprep.subr.bf16.mxu1 %v1728_v0  ;;  %1637 = vmatprep.subr.bf16.mxu0 %v1728_v0  ;;  %v1623_v62 = vpack.c.bf16 %v1874_v59, %v1872_v58  ;;  %v1895_v6 = vsub.f32 %v85_v63, %v133_v3  ;;  %v139_v19 = vand.u32 4294901760, %v91_v14  ;;  %v142_v20 = vand.u32 4294901760, %v94_v15 }
  0x11   :  { %v1897_v8 = vsub.f32 %v88_v1, %v136_v4  ;;  %v1916_v18 = vpack.c.bf16 %v136_v4, %v133_v3  ;;  %v1923_v23 = vsub.f32 %v46_v11, %v1914_v16  ;;  %v190_v25 = vand.u32 4294901760, %v1828_v34 }
  0x12   :  { %v1918_v21 = vsub.f32 %v91_v14, %v139_v19  ;;  %v1920_v22 = vsub.f32 %v94_v15, %v142_v20  ;;  %v197_v26 = vand.u32 4294901760, %v1830_v35  ;;  %v1934_v29 = vpack.c.bf16 %v142_v20, %v139_v19 }
  0x13   :  { %v1626_v13 = vpack.c.bf16 %v1897_v8, %v1895_v6  ;;  %v179_v28 = vand.u32 4294901760, %v1923_v23  ;;  %v191_v30 = vsub.f32 %v1828_v34, %v190_v25  ;;  %v204_v40 = vand.u32 4294901760, %v1832_v36  ;;  %v1204_v34 = vld [vmem:[%s2079_s2] ss:$0 sm:$0xff] }
  0x14   :  { %v1629_v27 = vpack.c.bf16 %v1920_v22, %v1918_v21  ;;  %v198_v32 = vsub.f32 %v1830_v35, %v197_v26  ;;  %v211_v41 = vand.u32 4294901760, %v1834_v37  ;;  %v1656_v56 = vpack.c.bf16 %v197_v26, %v190_v25 }
  0x15   :  { %v180_v33 = vsub.f32 %v1923_v23, %v179_v28  ;;  %v192_v38 = vand.u32 4294901760, %v191_v30  ;;  %v205_v57 = vsub.f32 %v1832_v36, %v204_v40  ;;  %v218_v1 = vand.u32 4294901760, %v1844_v43 }
  0x16   :  { %v199_v39 = vand.u32 4294901760, %v198_v32  ;;  %v212_v60 = vsub.f32 %v1834_v37, %v211_v41  ;;  %v225_v3 = vand.u32 4294901760, %v1846_v44  ;;  %v1659_v5 = vpack.c.bf16 %v211_v41, %v204_v40 }
  0x17   :  { %1567 = vmatpush3.bf16.xpose.msra.mxu1 %v1810_v24  ;;  %1639 = vmatpush3.bf16.xpose.msra.mxu0 %v1810_v24  ;;  %v181_v49 = vand.u32 4294901760, %v180_v33  ;;  %v206_v61 = vand.u32 4294901760, %v205_v57  ;;  %v219_v9 = vsub.f32 %v1844_v43, %v218_v1  ;;  %v232_v15 = vand.u32 4294901760, %v1849_v45 }
  0x18   :  { %1568 = vmatprep.subr.bf16.mxu1 %v1728_v0  ;;  %1640 = vmatprep.subr.bf16.mxu0 %v1728_v0  ;;  %v1584_v50 = vpack.c.bf16 %v199_v39, %v192_v38  ;;  %v213_v63 = vand.u32 4294901760, %v212_v60  ;;  %v226_v10 = vsub.f32 %v1846_v44, %v225_v3  ;;  %v239_v19 = vand.u32 4294901760, %v1852_v46 }
  0x19   :  { %v220_v11 = vand.u32 4294901760, %v219_v9  ;;  %v1662_v25 = vpack.c.bf16 %v225_v3, %v218_v1  ;;  %v233_v26 = vsub.f32 %v1849_v45, %v232_v15  ;;  %v246_v33 = vand.u32 4294901760, %v1856_v47 }
  0x1a   :  { %v1587_v4 = vpack.c.bf16 %v213_v63, %v206_v61  ;;  %v227_v14 = vand.u32 4294901760, %v226_v10  ;;  %v253_v38 = vand.u32 4294901760, %v1858_v48  ;;  %v1665_v40 = vpack.c.bf16 %v239_v19, %v232_v15 }
  0x1b   :  { %v234_v30 = vand.u32 4294901760, %v233_v26  ;;  %v247_v41 = vsub.f32 %v1856_v47, %v246_v33  ;;  %v260_v57 = vand.u32 4294901760, %v1872_v58  ;;  %v267_v60 = vand.u32 4294901760, %v1874_v59 }
  0x1c   :  { %v1590_v20 = vpack.c.bf16 %v227_v14, %v220_v11  ;;  %v1668_v63 = vpack.c.bf16 %v253_v38, %v246_v33  ;;  %v274_v9 = vand.u32 4294901760, %v1895_v6  ;;  %v281_v10 = vand.u32 4294901760, %v1897_v8 }
  0x1d   :  { %v261_v1 = vsub.f32 %v1872_v58, %v260_v57  ;;  %v268_v3 = vsub.f32 %v1874_v59, %v267_v60  ;;  %v1671_v14 = vpack.c.bf16 %v267_v60, %v260_v57  ;;  %v288_v26 = vand.u32 4294901760, %v1918_v21 }
  0x1e   :  { %v275_v15 = vsub.f32 %v1895_v6, %v274_v9  ;;  %v1192_v58 = vlaneseq }
  0x1f   :  { %1570 = vmatpush3.bf16.xpose.msra.mxu1 %v1824_v31  ;;  %1642 = vmatpush3.bf16.xpose.msra.mxu0 %v1824_v31  ;;  %v289_v33 = vsub.f32 %v1918_v21, %v288_v26 }
  0x20   :  { %1571 = vmatprep.subr.bf16.mxu1 %v1728_v0  ;;  %1643 = vmatprep.subr.bf16.mxu0 %v1728_v0 }
  0x27   :  { %1573 = vmatpush3.bf16.xpose.msra.mxu1 %v1870_v55  ;;  %1645 = vmatpush3.bf16.xpose.msra.mxu0 %v1870_v55 }
  0x28   :  { %1574 = vmatprep.subr.bf16.mxu1 %v1728_v0  ;;  %1646 = vmatprep.subr.bf16.mxu0 %v1728_v0 }
  0x2f   :  { %1576 = vmatpush3.bf16.xpose.msra.mxu1 %v1890_v2  ;;  %1648 = vmatpush3.bf16.xpose.msra.mxu0 %v1890_v2 }
  0x30   :  { %1577 = vmatprep.subr.bf16.mxu1 %v1728_v0  ;;  %1649 = vmatprep.subr.bf16.mxu0 %v1728_v0 }
  0x37   :  { %1579 = vmatpush3.bf16.xpose.msra.mxu1 %v1916_v18  ;;  %1651 = vmatpush3.bf16.xpose.msra.mxu0 %v1916_v18 }
  0x38   :  { %1580 = vmatprep.subr.bf16.mxu1 %v1728_v0  ;;  %1652 = vmatprep.subr.bf16.mxu0 %v1728_v0 }
  0x3f   :  { %1582 = vmatpush3.bf16.xpose.msra.mxu1 %v1934_v29  ;;  %1654 = vmatpush3.bf16.xpose.msra.mxu0 %v1934_v29 }
  0x40   :  { %1583 = vmatprep.subr.bf16.mxu1 %v1728_v0  ;;  %1655 = vmatprep.subr.bf16.mxu0 %v1728_v0 }
  0x46   :  { %1352 = vmatmul.mubr.f32.vlgmr.msra.gmra.mrb[0].mxu1 %v181_v49  ;;  %1457 = vmatmul.mubr.f32.vlgmr.msra.gmra.mrb[0].mxu0 %v179_v28  ;;  %v240_v28 = vsub.f32 %v1852_v46, %v239_v19  ;;  %v254_v49 = vsub.f32 %v1858_v48, %v253_v38  ;;  %v282_v19 = vsub.f32 %v1897_v8, %v281_v10 }
  0x47   :  { %1585 = vmatpush3.bf16.xpose.msra.mxu1 %v1584_v50  ;;  %1657 = vmatpush3.bf16.xpose.msra.mxu0 %v1656_v56  ;;  %v248_v50 = vand.u32 4294901760, %v247_v41 }
  0x48   :  { %1586 = vmatprep.subr.bf16.mxu1 %v1728_v0  ;;  %1658 = vmatprep.subr.bf16.mxu0 %v1728_v0  ;;  %v241_v32 = vand.u32 4294901760, %v240_v28  ;;  %v255_v56 = vand.u32 4294901760, %v254_v49  ;;  %v295_v28 = vand.u32 4294901760, %v1920_v22 }
  0x49   :  { %1386 = vmatprep.mubr.msk.f32.mxu1 %vm1729_vm1, %v1730_v7  ;;  %1491 = vmatprep.mubr.msk.f32.mxu0 %vm1729_vm1, %v1730_v7 }
  0x4a   :  { %v1593_v39 = vpack.c.bf16 %v241_v32, %v234_v30  ;;  %v1596_v61 = vpack.c.bf16 %v255_v56, %v248_v50  ;;  %v1674_v32 = vpack.c.bf16 %v281_v10, %v274_v9  ;;  %v296_v38 = vsub.f32 %v1920_v22, %v295_v28 }
  0x4b   :  { %v1677_v49 = vpack.c.bf16 %v295_v28, %v288_v26 }
  0x4f   :  { %1588 = vmatpush3.bf16.xpose.msra.mxu1 %v1587_v4  ;;  %1660 = vmatpush3.bf16.xpose.msra.mxu0 %v1659_v5  ;;  %v262_v4 = vand.u32 4294901760, %v261_v1  ;;  %v269_v5 = vand.u32 4294901760, %v268_v3 }
  0x50   :  { %1589 = vmatprep.subr.bf16.mxu1 %v1728_v0  ;;  %1661 = vmatprep.subr.bf16.mxu0 %v1728_v0 }
  0x51   :  { %v1599_v11 = vpack.c.bf16 %v269_v5, %v262_v4 }
  0x57   :  { %1591 = vmatpush3.bf16.xpose.msra.mxu1 %v1590_v20  ;;  %1663 = vmatpush3.bf16.xpose.msra.mxu0 %v1662_v25  ;;  %v276_v20 = vand.u32 4294901760, %v275_v15  ;;  %v283_v25 = vand.u32 4294901760, %v282_v19 }
  0x58   :  { %1592 = vmatprep.subr.bf16.mxu1 %v1728_v0  ;;  %1664 = vmatprep.subr.bf16.mxu0 %v1728_v0 }
  0x59   :  { %v1602_v30 = vpack.c.bf16 %v283_v25, %v276_v20 }
  0x5f   :  { %1594 = vmatpush3.bf16.xpose.msra.mxu1 %v1593_v39  ;;  %1666 = vmatpush3.bf16.xpose.msra.mxu0 %v1665_v40  ;;  %v290_v39 = vand.u32 4294901760, %v289_v33  ;;  %v297_v40 = vand.u32 4294901760, %v296_v38 }
  0x60   :  { %1595 = vmatprep.subr.bf16.mxu1 %v1728_v0  ;;  %1667 = vmatprep.subr.bf16.mxu0 %v1728_v0 }
  0x61   :  { %v1605_v41 = vpack.c.bf16 %v297_v40, %v290_v39 }
  0x67   :  { %1597 = vmatpush3.bf16.xpose.msra.mxu1 %v1596_v61  ;;  %1669 = vmatpush3.bf16.xpose.msra.mxu0 %v1668_v63 }
  0x68   :  { %1598 = vmatprep.subr.bf16.mxu1 %v1728_v0  ;;  %1670 = vmatprep.subr.bf16.mxu0 %v1728_v0 }
  0x6f   :  { %1600 = vmatpush3.bf16.xpose.msra.mxu1 %v1599_v11  ;;  %1672 = vmatpush3.bf16.xpose.msra.mxu0 %v1671_v14 }
  0x70   :  { %1601 = vmatprep.subr.bf16.mxu1 %v1728_v0  ;;  %1673 = vmatprep.subr.bf16.mxu0 %v1728_v0 }
  0x77   :  { %1603 = vmatpush3.bf16.xpose.msra.mxu1 %v1602_v30  ;;  %1675 = vmatpush3.bf16.xpose.msra.mxu0 %v1674_v32 }
  0x78   :  { %1604 = vmatprep.subr.bf16.mxu1 %v1728_v0  ;;  %1676 = vmatprep.subr.bf16.mxu0 %v1728_v0 }
  0x7f   :  { %1606 = vmatpush3.bf16.xpose.msra.mxu1 %v1605_v41  ;;  %1678 = vmatpush3.bf16.xpose.msra.mxu0 %v1677_v49 }
  0x80   :  { %1607 = vmatprep.subr.bf16.mxu1 %v1728_v0  ;;  %1679 = vmatprep.subr.bf16.mxu0 %v1728_v0 }
  0x86   :  { %1387 = vmatmul.mubr.f32.vlgmr.msra.gmra.mrb[0].mxu1 %v1914_v16  ;;  %1492 = vmatmul.mubr.f32.vlgmr.msra.gmra.mrb[0].mxu0 %v1914_v16 }
  0x87   :  { %1609 = vmatpush3.bf16.xpose.msra.mxu1 %v1608_v42  ;;  %1681 = vmatpush3.bf16.xpose.msra.mxu0 %v1784_v12  ;;  %v739_v12 = vld [vmem:[%s2077_s4] sm:$0xf] }
  0x88   :  { %1610 = vmatprep.subr.bf16.mxu1 %v1728_v0  ;;  %1682 = vmatprep.subr.bf16.mxu0 %v1728_v0 }
  0x89   :  { %1421 = vmatprep.mubr.msk.f32.mxu1 %vm1729_vm1, %v1730_v7  ;;  %1526 = vmatprep.mubr.msk.f32.mxu0 %vm1729_vm1, %v1730_v7 }
  0x8f   :  { %1612 = vmatpush3.bf16.xpose.msra.mxu1 %v1611_v51  ;;  %1684 = vmatpush3.bf16.xpose.msra.mxu0 %v1796_v17  ;;  %v738_v17 = vld [vmem:[%s2078_s3] sm:$0xf] }
  0x90   :  { %1613 = vmatprep.subr.bf16.mxu1 %v1728_v0  ;;  %1685 = vmatprep.subr.bf16.mxu0 %v1728_v0 }
  0x97   :  { %1615 = vmatpush3.bf16.xpose.msra.mxu1 %v1614_v52  ;;  %1687 = vmatpush3.bf16.xpose.msra.mxu0 %v1810_v24  ;;  %v811_v24 = vand.u32 4294901760, %v738_v17 }
  0x98   :  { %1616 = vmatprep.subr.bf16.mxu1 %v1728_v0  ;;  %1688 = vmatprep.subr.bf16.mxu0 %v1728_v0 }
  0x9f   :  { %1618 = vmatpush3.bf16.xpose.msra.mxu1 %v1617_v53  ;;  %1690 = vmatpush3.bf16.xpose.msra.mxu0 %v1824_v31  ;;  %v812_v31 = vsub.f32 %v738_v17, %v811_v24 }
  0xa0   :  { %1619 = vmatprep.subr.bf16.mxu1 %v1728_v0  ;;  %1691 = vmatprep.subr.bf16.mxu0 %v1728_v0 }
  0xa1   :  { %v813_v37 = vand.u32 4294901760, %v812_v31 }
  0xa3   :  { %v814_v46 = vsub.f32 %v812_v31, %v813_v37 }
  0xa5   :  { %v815_v51 = vand.u32 4294901760, %v814_v46 }
  0xa7   :  { %1621 = vmatpush3.bf16.xpose.msra.mxu1 %v1620_v54  ;;  %1693 = vmatpush3.bf16.xpose.msra.mxu0 %v1870_v55 }
  0xa8   :  { %1622 = vmatprep.subr.bf16.mxu1 %v1728_v0  ;;  %1694 = vmatprep.subr.bf16.mxu0 %v1728_v0 }
  0xaf   :  { %1624 = vmatpush3.bf16.xpose.msra.mxu1 %v1623_v62  ;;  %1696 = vmatpush3.bf16.xpose.msra.mxu0 %v1890_v2  ;;  %v1193_v62 = vand.u32 127, %v1192_v58 }
  0xb0   :  { %1625 = vmatprep.subr.bf16.mxu1 %v1728_v0  ;;  %1697 = vmatprep.subr.bf16.mxu0 %v1728_v0 }
  0xb1   :  { %vm1196_vm2 = vcmp.lt.s32.totalorder %v1193_v62, 8 }
  0xb7   :  { %1627 = vmatpush3.bf16.xpose.msra.mxu1 %v1626_v13  ;;  %1699 = vmatpush3.bf16.xpose.msra.mxu0 %v1916_v18 }
  0xb8   :  { %1628 = vmatprep.subr.bf16.mxu1 %v1728_v0  ;;  %1700 = vmatprep.subr.bf16.mxu0 %v1728_v0  ;;  %v1731_v0 = vmov 0  }
  0xb9   :  { %1727 = vset.pattern.permute.xlu0 %v1731_v0 }
  0xba   :  { %742 = vperm.xlu0 %1727, %v739_v12  }
  0xbf   :  { %1630 = vmatpush3.bf16.xpose.msra.mxu1 %v1629_v27  ;;  %1702 = vmatpush3.bf16.xpose.msra.mxu0 %v1934_v29 }
  0xc0   :  { %1529 = vmatprep.subr.mxu0 %v1730_v7  ;;  %1544 = vmatprep.subr.mxu1 %v1730_v7 }
  0xc6   :  { %1422 = vmatmul.mubr.f32.vlgmr.msra.gmra.mrb[0].mxu1 %v1923_v23  ;;  %1527 = vmatmul.mubr.f32.vlgmr.msra.gmra.mrb[0].mxu0 %v1914_v16 }
  0xc7   :  { %1531 = vmatprep.mubr.msk.f32.mxu0 %vm1729_vm1, %v1730_v7  ;;  %1546 = vmatprep.mubr.msk.f32.mxu1 %vm1729_vm1, %v1730_v7 }
 0x139   :  { %v743_v59 = vpop.permute.xlu0 %742 }
 0x199   :  { %v438_v35 = vpop.f32.mrb[0].mxu1  ;;  %v733_v36 = vpop.f32.mrb[0].mxu0 }
 0x19a   :  { %v1703_v42 = vadd.f32 %v1204_v34, %v438_v35  ;;  %v1423_v43 = vpop.f32.mrb[1].mxu1  ;;  %v1528_v44 = vpop.f32.mrb[1].mxu0 }
 0x19c   :  { %v1704_v45 = vadd.f32 %v1703_v42, %v733_v36 }
 0x19e   :  { %v737_v47 = vmax.f32 %v1704_v45, 0.0 }
 0x1a0   :  { %v746_v48 = vand.u32 4294901760, %v737_v47 }
 0x1a2   :  { %v823_v52 = vsub.f32 %v737_v47, %v746_v48  ;;  %1530 = vmatpush3.xpose.msra.mxu0 %v746_v48  ;;  %1545 = vmatpush3.xpose.msra.mxu1 %v746_v48 }
 0x1a3   :  { %1549 = vmatprep.subr.mxu1 %v1730_v7  ;;  %1534 = vmatprep.subr.mxu0 %v1730_v7 }
 0x1a4   :  { %v824_v53 = vand.u32 4294901760, %v823_v52 }
 0x1a5   :  { %1532 = vmatmul.mubr.f32.vlgmr.msra.gmra.mrb[2].mxu0 %v815_v51  ;;  %1547 = vmatmul.mubr.f32.vlgmr.msra.gmra.mrb[2].mxu1 %v813_v37 }
 0x1a6   :  { %v825_v54 = vsub.f32 %v823_v52, %v824_v53  ;;  %1550 = vmatpush3.xpose.msra.mxu1 %v824_v53  ;;  %1536 = vmatprep.mubr.msk.f32.mxu0 %vm1729_vm1, %v1730_v7 }
 0x1a7   :  { %1551 = vmatprep.mubr.msk.f32.mxu1 %vm1729_vm1, %v1730_v7  ;;  %1554 = vmatprep.subr.mxu1 %v1730_v7 }
 0x1a8   :  { %v826_v55 = vand.u32 4294901760, %v825_v54 }
 0x1aa   :  { %1535 = vmatpush3.xpose.msra.mxu0 %v826_v55 }
 0x1ab   :  { %1539 = vmatprep.subr.mxu0 %v1730_v7 }
 0x1ad   :  { %1537 = vmatmul.mubr.f32.vlgmr.msra.gmra.mrb[2].mxu0 %v811_v24  ;;  %1552 = vmatmul.mubr.f32.vlgmr.msra.gmra.mrb[2].mxu1 %v811_v24 }
 0x1ae   :  { %1555 = vmatpush3.xpose.msra.mxu1 %v746_v48  ;;  %1540 = vmatpush3.xpose.msra.mxu0 %v823_v52 }
 0x1af   :  { %1541 = vmatprep.mubr.msk.f32.mxu0 %vm1729_vm1, %v1730_v7  ;;  %1556 = vmatprep.mubr.msk.f32.mxu1 %vm1729_vm1, %v1730_v7 }
 0x1b5   :  { %1542 = vmatmul.mubr.f32.vlgmr.msra.gmra.mrb[2].mxu0 %v812_v31  ;;  %1557 = vmatmul.mubr.f32.vlgmr.msra.gmra.mrb[2].mxu1 %v811_v24 }
 0x288   :  { %v967_v2 = vpop.f32.mrb[2].mxu0  ;;  %v1187_v6 = vpop.f32.mrb[2].mxu1 }
 0x289   :  { %v1705_v8 = vadd.f32 %v967_v2, %v743_v59  ;;  %v1543_v13 = vpop.f32.mrb[3].mxu0  ;;  %v1558_v16 = vpop.f32.mrb[3].mxu1 }
 0x28b   :  { %v1706_v18 = vadd.f32 %v1705_v8, %v1187_v6 }
 0x28d   :  { %v1197_v21 = vsel %vm1196_vm2, %v1706_v18, -inf }
 0x28e   :  { %1199 = vst.msk [vmem:[%s2080_s5] sm:$0xf] %vm1198_vm3, %v1197_v21 }

</bundles_post_ra>
